<compile_context>
chip_gen: v5e
topology: v5e:2x2
jax: 0.10.0
libtpu: 0.0.40
codegen_flags: <defaults>
</compile_context>

<pallas_src>
import jax
import jax.numpy as jnp
from jax.experimental import pallas as pl
from jax.experimental.pallas import tpu as pltpu

N_OBS = 6
N_ACTIONS = 4
N_LAYERS = 5                    # matches the PyTorch module's n_layers arg
HIDDEN = 256
N_HIDDEN = N_LAYERS - 1         # 4 hidden Linear layers
N_LIN = N_LAYERS + 1            # 6 Linear layers total (input + hidden + output)
MAX_TILE = 1024                 # large-batch row tile (perf-review sweep target)


def dqn_kernel(x_ref, w0_ref, wh_ref, wo_ref, bh_ref, bo_ref, out_ref):
    # x_ref:  (TILE_B, N_OBS)             f32
    # w0_ref: (N_OBS, HIDDEN)             bf16
    # wh_ref: (N_HIDDEN, HIDDEN, HIDDEN)  bf16
    # wo_ref: (HIDDEN, N_ACTIONS)         bf16
    # bh_ref: (N_LAYERS, HIDDEN)          f32  (input-layer + hidden-layer biases)
    # bo_ref: (1, N_ACTIONS)              f32  (output-layer bias)
    # out_ref:(TILE_B, N_ACTIONS)         f32
    h = x_ref[...].astype(jnp.bfloat16)

    # Input layer + ReLU (ReLU on the f32 accumulator, then downcast).
    acc = jnp.dot(h, w0_ref[...], preferred_element_type=jnp.float32) + bh_ref[0:1, :]
    h = jnp.maximum(acc, 0.0).astype(jnp.bfloat16)

    # Hidden layers + ReLU.
    for li in range(N_HIDDEN):
        acc = (jnp.dot(h, wh_ref[li], preferred_element_type=jnp.float32)
               + bh_ref[li + 1:li + 2, :])
        h = jnp.maximum(acc, 0.0).astype(jnp.bfloat16)

    # Output layer (no activation), narrow store (N_ACTIONS lanes).
    acc = jnp.dot(h, wo_ref[...], preferred_element_type=jnp.float32) + bo_ref[...]
    out_ref[...] = acc.astype(out_ref.dtype)


def pack_params(params):
    """Pack params ONCE (hoisted out of the per-inference call).

    params: list of (w (in,out), b (out,)) f32 tuples, PyTorch Linear order.
    Returns (w_first bf16, w_hidden bf16, w_last bf16, b_hidden f32, b_last f32).
    """
    (w0, b0) = params[0]
    hidden = params[1:-1]
    (wo, bo) = params[-1]

    w_first = w0.astype(jnp.bfloat16)                                     # (N_OBS, H)
    w_hidden = jnp.stack([w.astype(jnp.bfloat16) for (w, _) in hidden])   # (N_HIDDEN, H, H)
    w_last = wo.astype(jnp.bfloat16)                                      # (H, N_ACTIONS)
    b_hidden = jnp.stack([b0] + [b for (_, b) in hidden]).astype(jnp.float32)  # (N_LAYERS, H)
    b_last = bo.reshape(1, N_ACTIONS).astype(jnp.float32)                 # (1, N_ACTIONS)
    return w_first, w_hidden, w_last, b_hidden, b_last


def _round_up(n, m):
    return ((n + m - 1) // m) * m


def _choose_tile(batch):
    if batch < 256:
        # Single 16-aligned tile (bf16 packs 16 sublanes per vreg).
        return max(16, _round_up(batch, 16))
    # >= 2 grid steps so v7x's second TensorCore gets work; cap at MAX_TILE to
    # amortize per-grid-step overhead while keeping VMEM footprint small.
    half = _round_up(pl.cdiv(batch, 2), 16)
    return min(MAX_TILE, half)


def dqn_forward(x, packed):
    """x: (batch, N_OBS) f32; packed: output of pack_params (pre-packed once)."""
    w_first, w_hidden, w_last, b_hidden, b_last = packed
    batch = x.shape[0]

    tile_b = _choose_tile(batch)
    padded = pl.cdiv(batch, tile_b) * tile_b
    if padded != batch:
        x = jnp.pad(x, ((0, padded - batch), (0, 0)))

    flops = 2 * padded * (N_OBS * HIDDEN + N_HIDDEN * HIDDEN * HIDDEN + HIDDEN * N_ACTIONS)
    bytes_accessed = (x.size * 4 + w_first.size * 2 + w_hidden.size * 2 + w_last.size * 2
                      + b_hidden.size * 4 + b_last.size * 4 + padded * N_ACTIONS * 4)

    out = pl.pallas_call(
        dqn_kernel,
        out_shape=jax.ShapeDtypeStruct((padded, N_ACTIONS), jnp.float32),
        grid=(padded // tile_b,),
        in_specs=[
            pl.BlockSpec((tile_b, N_OBS), lambda i: (i, 0)),
            # Constant index_maps: params stay VMEM-resident, no re-DMA per step.
            pl.BlockSpec((N_OBS, HIDDEN), lambda i: (0, 0)),
            pl.BlockSpec((N_HIDDEN, HIDDEN, HIDDEN), lambda i: (0, 0, 0)),
            pl.BlockSpec((HIDDEN, N_ACTIONS), lambda i: (0, 0)),
            pl.BlockSpec((N_LAYERS, HIDDEN), lambda i: (0, 0)),
            pl.BlockSpec((1, N_ACTIONS), lambda i: (0, 0)),
        ],
        out_specs=pl.BlockSpec((tile_b, N_ACTIONS), lambda i: (i, 0)),
        compiler_params=pltpu.CompilerParams(
            dimension_semantics=("parallel",),
            vmem_limit_bytes=16 << 20,   # ~3 MiB actual footprint; safe on v5e/v6e/v7x
        ),
        cost_estimate=pl.CostEstimate(
            flops=flops, transcendentals=0, bytes_accessed=bytes_accessed),
    )(x, w_first, w_hidden, w_last, b_hidden, b_last)

    return out[:batch] if padded != batch else out


def init_params(key):
    """Deterministic init mirroring PyTorch nn.Linear (uniform +/- 1/sqrt(fan_in))."""
    dims = [(N_OBS, HIDDEN)]
    dims += [(HIDDEN, HIDDEN)] * N_HIDDEN
    dims += [(HIDDEN, N_ACTIONS)]
    params = []
    for (fan_in, fan_out) in dims:
        key, kw, kb = jax.random.split(key, 3)
        bound = 1.0 / jnp.sqrt(jnp.float32(fan_in))
        w = jax.random.uniform(kw, (fan_in, fan_out), jnp.float32, -bound, bound)
        b = jax.random.uniform(kb, (fan_out,), jnp.float32, -bound, bound)
        params.append((w, b))
    return params


def reference_forward(x, params):
    """Pure-JAX reference emulating the kernel's bf16 weight/activation rounding."""
    h = x.astype(jnp.bfloat16).astype(jnp.float32)
    for i, (w, b) in enumerate(params):
        w_bf = w.astype(jnp.bfloat16).astype(jnp.float32)
        h = h @ w_bf + b.reshape(1, -1)
        if i < len(params) - 1:
            h = jnp.maximum(h, 0.0).astype(jnp.bfloat16).astype(jnp.float32)
    return h


if __name__ == "__main__":
    key = jax.random.PRNGKey(0)
    key, kx = jax.random.split(key)
    params = init_params(key)

    # Pack parameters ONCE (hoisted out of the inference call, per perf review).
    packed = pack_params(params)
    packed = tuple(jax.block_until_ready(p) for p in packed)

    fwd = jax.jit(dqn_forward)

    # Small-batch (action-selection) path: single 16-row tile, padded rows sliced off.
    batch = 8
    x_small = jax.random.normal(kx, (batch, N_OBS), jnp.float32)
    out_small = jax.block_until_ready(fwd(x_small, packed))
    ref_small = reference_forward(x_small, params)
    assert out_small.shape == (batch, N_ACTIONS)
    assert jnp.allclose(out_small, ref_small, atol=5e-2, rtol=5e-2), "small-batch mismatch"

    # Moderate batch exercising the 2-tile "parallel" grid (both TCs on v7x).
    key, kx2 = jax.random.split(key)
    x_mid = jax.random.normal(kx2, (384, N_OBS), jnp.float32)
    out_mid = jax.block_until_ready(fwd(x_mid, packed))
    ref_mid = reference_forward(x_mid, params)
    assert out_mid.shape == (384, N_ACTIONS)
    assert jnp.allclose(out_mid, ref_mid, atol=5e-2, rtol=5e-2), "multi-tile mismatch"

    print("KERNEL_OK")
</pallas_src>

<mosaic_0001>
module attributes {stable_mosaic.version = 11 : i64} {
  func.func @dqn_kernel(%arg0: i32, %arg1: memref<16x6xf32, #tpu.memory_space<vmem>>, %arg2: memref<6x256xbf16, #tpu.memory_space<vmem>>, %arg3: memref<4x256x256xbf16, #tpu.memory_space<vmem>>, %arg4: memref<256x4xbf16, #tpu.memory_space<vmem>>, %arg5: memref<5x256xf32, #tpu.memory_space<vmem>>, %arg6: memref<1x4xf32, #tpu.memory_space<vmem>>, %arg7: memref<16x4xf32, #tpu.memory_space<vmem>>) attributes {dimension_semantics = [#tpu.dimension_semantics<parallel>], iteration_bounds = array<i64: 1>, scalar_prefetch = 0 : i64, scratch_operands = 0 : i64, tpu.core_type = #tpu.core_type<tc>, window_params = [{transform_indices = @transform_0, window_bounds = array<i64: 16, 6>}, {pipeline_mode = #tpu.pipeline_mode<synchronous>, transform_indices = @transform_1, window_bounds = array<i64: 6, 256>}, {pipeline_mode = #tpu.pipeline_mode<synchronous>, transform_indices = @transform_2, window_bounds = array<i64: 4, 256, 256>}, {pipeline_mode = #tpu.pipeline_mode<synchronous>, transform_indices = @transform_3, window_bounds = array<i64: 256, 4>}, {pipeline_mode = #tpu.pipeline_mode<synchronous>, transform_indices = @transform_4, window_bounds = array<i64: 5, 256>}, {pipeline_mode = #tpu.pipeline_mode<synchronous>, transform_indices = @transform_5, window_bounds = array<i64: 1, 4>}, {transform_indices = @transform_6, window_bounds = array<i64: 16, 4>}]} {
    %c0 = arith.constant 0 : index
    %c0_0 = arith.constant 0 : index
    %0 = vector.load %arg1[%c0, %c0_0] : memref<16x6xf32, #tpu.memory_space<vmem>>, vector<16x6xf32>
    %1 = arith.truncf %0 : vector<16x6xf32> to vector<16x6xbf16>
    %c0_1 = arith.constant 0 : index
    %c0_2 = arith.constant 0 : index
    %2 = vector.load %arg2[%c0_1, %c0_2] : memref<6x256xbf16, #tpu.memory_space<vmem>>, vector<6x256xbf16>
    %cst = arith.constant dense<0.000000e+00> : vector<16x256xf32>
    %3 = tpu.matmul %1, %2, %cst {dimension_numbers = #tpu.dot_dimension_numbers<[1], [0], [0], [1], [0, 0, 1, 1], [], []>} : vector<16x6xbf16>, vector<6x256xbf16>, vector<16x256xf32> -> vector<16x256xf32>
    %c0_3 = arith.constant 0 : index
    %c0_4 = arith.constant 0 : index
    %4 = vector.load %arg5[%c0_3, %c0_4] : memref<5x256xf32, #tpu.memory_space<vmem>>, vector<1x256xf32>
    %5 = vector.broadcast %4 : vector<1x256xf32> to vector<16x256xf32>
    %6 = arith.addf %3, %5 : vector<16x256xf32>
    %cst_5 = arith.constant 0.000000e+00 : f32
    %7 = vector.broadcast %cst_5 : f32 to vector<16x256xf32>
    %8 = arith.maximumf %6, %7 : vector<16x256xf32>
    %9 = arith.truncf %8 : vector<16x256xf32> to vector<16x256xbf16>
    %c0_6 = arith.constant 0 : index
    %c0_7 = arith.constant 0 : index
    %c0_8 = arith.constant 0 : index
    %10 = vector.load %arg3[%c0_6, %c0_7, %c0_8] : memref<4x256x256xbf16, #tpu.memory_space<vmem>>, vector<1x256x256xbf16>
    %11 = vector.shape_cast %10 : vector<1x256x256xbf16> to vector<256x256xbf16>
    %cst_9 = arith.constant dense<0.000000e+00> : vector<16x256xf32>
    %12 = tpu.matmul %9, %11, %cst_9 {dimension_numbers = #tpu.dot_dimension_numbers<[1], [0], [0], [1], [0, 0, 1, 1], [], []>} : vector<16x256xbf16>, vector<256x256xbf16>, vector<16x256xf32> -> vector<16x256xf32>
    %c1 = arith.constant 1 : index
    %c0_10 = arith.constant 0 : index
    %13 = vector.load %arg5[%c1, %c0_10] : memref<5x256xf32, #tpu.memory_space<vmem>>, vector<1x256xf32>
    %14 = vector.broadcast %13 : vector<1x256xf32> to vector<16x256xf32>
    %15 = arith.addf %12, %14 : vector<16x256xf32>
    %cst_11 = arith.constant 0.000000e+00 : f32
    %16 = vector.broadcast %cst_11 : f32 to vector<16x256xf32>
    %17 = arith.maximumf %15, %16 : vector<16x256xf32>
    %18 = arith.truncf %17 : vector<16x256xf32> to vector<16x256xbf16>
    %c1_12 = arith.constant 1 : index
    %c0_13 = arith.constant 0 : index
    %c0_14 = arith.constant 0 : index
    %19 = vector.load %arg3[%c1_12, %c0_13, %c0_14] : memref<4x256x256xbf16, #tpu.memory_space<vmem>>, vector<1x256x256xbf16>
    %20 = vector.shape_cast %19 : vector<1x256x256xbf16> to vector<256x256xbf16>
    %cst_15 = arith.constant dense<0.000000e+00> : vector<16x256xf32>
    %21 = tpu.matmul %18, %20, %cst_15 {dimension_numbers = #tpu.dot_dimension_numbers<[1], [0], [0], [1], [0, 0, 1, 1], [], []>} : vector<16x256xbf16>, vector<256x256xbf16>, vector<16x256xf32> -> vector<16x256xf32>
    %c2 = arith.constant 2 : index
    %c0_16 = arith.constant 0 : index
    %22 = vector.load %arg5[%c2, %c0_16] : memref<5x256xf32, #tpu.memory_space<vmem>>, vector<1x256xf32>
    %23 = vector.broadcast %22 : vector<1x256xf32> to vector<16x256xf32>
    %24 = arith.addf %21, %23 : vector<16x256xf32>
    %cst_17 = arith.constant 0.000000e+00 : f32
    %25 = vector.broadcast %cst_17 : f32 to vector<16x256xf32>
    %26 = arith.maximumf %24, %25 : vector<16x256xf32>
    %27 = arith.truncf %26 : vector<16x256xf32> to vector<16x256xbf16>
    %c2_18 = arith.constant 2 : index
    %c0_19 = arith.constant 0 : index
    %c0_20 = arith.constant 0 : index
    %28 = vector.load %arg3[%c2_18, %c0_19, %c0_20] : memref<4x256x256xbf16, #tpu.memory_space<vmem>>, vector<1x256x256xbf16>
    %29 = vector.shape_cast %28 : vector<1x256x256xbf16> to vector<256x256xbf16>
    %cst_21 = arith.constant dense<0.000000e+00> : vector<16x256xf32>
    %30 = tpu.matmul %27, %29, %cst_21 {dimension_numbers = #tpu.dot_dimension_numbers<[1], [0], [0], [1], [0, 0, 1, 1], [], []>} : vector<16x256xbf16>, vector<256x256xbf16>, vector<16x256xf32> -> vector<16x256xf32>
    %c3 = arith.constant 3 : index
    %c0_22 = arith.constant 0 : index
    %31 = vector.load %arg5[%c3, %c0_22] : memref<5x256xf32, #tpu.memory_space<vmem>>, vector<1x256xf32>
    %32 = vector.broadcast %31 : vector<1x256xf32> to vector<16x256xf32>
    %33 = arith.addf %30, %32 : vector<16x256xf32>
    %cst_23 = arith.constant 0.000000e+00 : f32
    %34 = vector.broadcast %cst_23 : f32 to vector<16x256xf32>
    %35 = arith.maximumf %33, %34 : vector<16x256xf32>
    %36 = arith.truncf %35 : vector<16x256xf32> to vector<16x256xbf16>
    %c3_24 = arith.constant 3 : index
    %c0_25 = arith.constant 0 : index
    %c0_26 = arith.constant 0 : index
    %37 = vector.load %arg3[%c3_24, %c0_25, %c0_26] : memref<4x256x256xbf16, #tpu.memory_space<vmem>>, vector<1x256x256xbf16>
    %38 = vector.shape_cast %37 : vector<1x256x256xbf16> to vector<256x256xbf16>
    %cst_27 = arith.constant dense<0.000000e+00> : vector<16x256xf32>
    %39 = tpu.matmul %36, %38, %cst_27 {dimension_numbers = #tpu.dot_dimension_numbers<[1], [0], [0], [1], [0, 0, 1, 1], [], []>} : vector<16x256xbf16>, vector<256x256xbf16>, vector<16x256xf32> -> vector<16x256xf32>
    %c4 = arith.constant 4 : index
    %c0_28 = arith.constant 0 : index
    %40 = vector.load %arg5[%c4, %c0_28] : memref<5x256xf32, #tpu.memory_space<vmem>>, vector<1x256xf32>
    %41 = vector.broadcast %40 : vector<1x256xf32> to vector<16x256xf32>
    %42 = arith.addf %39, %41 : vector<16x256xf32>
    %cst_29 = arith.constant 0.000000e+00 : f32
    %43 = vector.broadcast %cst_29 : f32 to vector<16x256xf32>
    %44 = arith.maximumf %42, %43 : vector<16x256xf32>
    %45 = arith.truncf %44 : vector<16x256xf32> to vector<16x256xbf16>
    %c0_30 = arith.constant 0 : index
    %c0_31 = arith.constant 0 : index
    %46 = vector.load %arg4[%c0_30, %c0_31] : memref<256x4xbf16, #tpu.memory_space<vmem>>, vector<256x4xbf16>
    %cst_32 = arith.constant dense<0.000000e+00> : vector<16x4xf32>
    %47 = tpu.matmul %45, %46, %cst_32 {dimension_numbers = #tpu.dot_dimension_numbers<[1], [0], [0], [1], [0, 0, 1, 1], [], []>} : vector<16x256xbf16>, vector<256x4xbf16>, vector<16x4xf32> -> vector<16x4xf32>
    %c0_33 = arith.constant 0 : index
    %c0_34 = arith.constant 0 : index
    %48 = vector.load %arg6[%c0_33, %c0_34] : memref<1x4xf32, #tpu.memory_space<vmem>>, vector<1x4xf32>
    %49 = vector.broadcast %48 : vector<1x4xf32> to vector<16x4xf32>
    %50 = arith.addf %47, %49 : vector<16x4xf32>
    %c0_35 = arith.constant 0 : index
    %c0_36 = arith.constant 0 : index
    %51 = vector.load %arg7[%c0_35, %c0_36] : memref<16x4xf32, #tpu.memory_space<vmem>>, vector<16x4xf32>
    tpu.vector_store %arg7[%c0_35, %c0_36], %50 {strides = array<i32>} : memref<16x4xf32, #tpu.memory_space<vmem>>, vector<16x4xf32>,
    return
  }
  func.func @transform_0(%arg0: i32) -> (i32, i32) {
    %c0_i32 = arith.constant 0 : i32
    %c0_i32_0 = arith.constant 0 : i32
    return %arg0, %c0_i32 : i32, i32
  }
  func.func @transform_1(%arg0: i32) -> (i32, i32) {
    %c0_i32 = arith.constant 0 : i32
    %c0_i32_0 = arith.constant 0 : i32
    %c0_i32_1 = arith.constant 0 : i32
    return %c0_i32, %c0_i32_0 : i32, i32
  }
  func.func @transform_2(%arg0: i32) -> (i32, i32, i32) {
    %c0_i32 = arith.constant 0 : i32
    %c0_i32_0 = arith.constant 0 : i32
    %c0_i32_1 = arith.constant 0 : i32
    %c0_i32_2 = arith.constant 0 : i32
    return %c0_i32, %c0_i32_0, %c0_i32_1 : i32, i32, i32
  }
  func.func @transform_3(%arg0: i32) -> (i32, i32) {
    %c0_i32 = arith.constant 0 : i32
    %c0_i32_0 = arith.constant 0 : i32
    %c0_i32_1 = arith.constant 0 : i32
    return %c0_i32, %c0_i32_0 : i32, i32
  }
  func.func @transform_4(%arg0: i32) -> (i32, i32) {
    %c0_i32 = arith.constant 0 : i32
    %c0_i32_0 = arith.constant 0 : i32
    %c0_i32_1 = arith.constant 0 : i32
    return %c0_i32, %c0_i32_0 : i32, i32
  }
  func.func @transform_5(%arg0: i32) -> (i32, i32) {
    %c0_i32 = arith.constant 0 : i32
    %c0_i32_0 = arith.constant 0 : i32
    %c0_i32_1 = arith.constant 0 : i32
    return %c0_i32, %c0_i32_0 : i32, i32
  }
  func.func @transform_6(%arg0: i32) -> (i32, i32) {
    %c0_i32 = arith.constant 0 : i32
    %c0_i32_0 = arith.constant 0 : i32
    return %arg0, %c0_i32 : i32, i32
  }
}

</mosaic_0001>

<bundles_post_ra>
// kernel: dqn_forward.1
= control target key start
LH: loop header
LB: loop body
LE: loop exit
PB: predicated region body
PF: predicated region fallthrough
CT: control target
= control target key end

     0   :  { %11 = vsyncpa [#allocation3], 0  ;;  %s2071_s24 = smov [#allocation2]   ;;  %s2072_s26 = smov 128   ;;  %s2197_s0 = inlined_call_operand.vmem [shape: f32[16,6], index: 0, kind: input, shape index: {}]   ;;  %s2198_s1 = inlined_call_operand.vmem [shape: bf16[6,256], index: 1, kind: input, shape index: {}]   ;;  %s2199_s2 = inlined_call_operand.hbm [shape: bf16[4,256,256], index: 2, kind: input, shape index: {}]   ;;  %s2200_s3 = inlined_call_operand.vmem [shape: bf16[256,4], index: 3, kind: input, shape index: {}]   ;;  %s2201_s4 = inlined_call_operand.vmem [shape: f32[5,256], index: 4, kind: input, shape index: {}]   ;;  %s2202_s5 = inlined_call_operand.vmem [shape: f32[1,4], index: 5, kind: input, shape index: {}]   ;;  %s2203_s6 = inlined_call_operand.vmem [shape: f32[16,4], index: 6, kind: output, shape index: {}]  }
   0x1   :  { %s20_s23 = sshll.u32 %s2199_s2, 4  ;;  %s22_s25 = sshll.u32 %s2071_s24, 4  ;;  %s21_s23 = int_to_ptr.hbm [resolvable:$true] %s20_s23  ;;  %s23_s25 = int_to_ptr.vmem [resolvable:$true] %s22_s25 }
   0x2   :  { %s2073_s27 = smov 8  }
   0x3   :  { %28 = dma.hbm_to_vmem [thread:$0]  %s21_s23, 16384, %s23_s25, [#allocation3], %s2072_s26, %s2072_s26, %s2073_s27  }
   0x4   :  { %2069 = dma.done.wait [#allocation3], 16384  }
   0x5   :  { %2070 = vsyncadd [#allocation3], 4294950912  ;;  %v43_v0 = vld [vmem:[%s2198_s1] sm:$0x77]  ;;  %vm59_vm0 = vcmask 1042432   ;;  %v41_v2 = vld [vmem:[%s2197_s0 + $0x8] sm:$0xff] }
   0x6   :  { %v40_v1 = vld [vmem:[%s2197_s0] sm:$0xff]  ;;  %vm55_vm1 = vcmask 48128   ;;  %v51_v3 = vunpack.c.l.b16 %v43_v0  ;;  %v52_v4 = vunpack.c.h.b16 %v43_v0  ;;  %v1376_v5 = vld [vmem:[#allocation2 + $0x70] sm:$0xf]  ;;  %v1912_v6 = vld [vmem:[#allocation2 + $0x74] sm:$0xf0] }
   0x7   :  { %v1440_v7 = vld [vmem:[#allocation2 + $0xf0] sm:$0xf]  ;;  %v1377_v8 = vor.u32 %v1912_v6, %v1376_v5  ;;  %v1928_v9 = vld [vmem:[#allocation2 + $0xf4] sm:$0xf0]  ;;  %v1911_v10 = vld [vmem:[#allocation2 + $0x74] sm:$0xf]  ;;  %v42_v25 = vpack.c.bf16 %v41_v2, %v40_v1 }
   0x8   :  { %v1378_v11 = vld [vmem:[#allocation2 + $0x78] sm:$0xf0]  ;;  %v53_v12 = vpack.c.b16 %v51_v3, %v51_v3  ;;  %v54_v13 = vpack.c.b16 %v52_v4, %v52_v4  ;;  %v1441_v14 = vor.u32 %v1928_v9, %v1440_v7  ;;  %v1927_v16 = vld [vmem:[#allocation2 + $0xf4] sm:$0xf]  ;;  %v1368_v18 = vld [vmem:[#allocation2 + $0x60] sm:$0xf] }
   0x9   :  { %v1381_v15 = vor.u32 %v1911_v10, %v1378_v11  ;;  %v1442_v17 = vld [vmem:[#allocation2 + $0xf8] sm:$0xf0]  ;;  %299 = vmatpush.bf16.msra.mxu2 %v1377_v8  ;;  %v1910_v20 = vld [vmem:[#allocation2 + $0x64] sm:$0xf0]  ;;  %v1432_v21 = vld [vmem:[#allocation2 + $0xe0] sm:$0xf] }
   0xa   :  { %v1445_v19 = vor.u32 %v1927_v16, %v1442_v17  ;;  %v1926_v22 = vld [vmem:[#allocation2 + $0xe4] sm:$0xf0]  ;;  %v61_v23 = vsel %vm59_vm0, %v53_v12, 0  ;;  %v64_v24 = vsel %vm59_vm0, %v54_v13, 0  ;;  %313 = vmatpush.bf16.msra.mxu3 %v1441_v14  ;;  %v1369_v26 = vor.u32 %v1910_v20, %v1368_v18  ;;  %v1909_v27 = vld [vmem:[#allocation2 + $0x64] sm:$0xf] }
   0xb   :  { %v1370_v28 = vld [vmem:[#allocation2 + $0x68] sm:$0xf0]  ;;  %73 = vmatpush.bf16.msra.mxu0 %v61_v23  ;;  %87 = vmatpush.bf16.msra.mxu1 %v64_v24  ;;  %v1433_v29 = vor.u32 %v1926_v22, %v1432_v21  ;;  %v1925_v30 = vld [vmem:[#allocation2 + $0xe4] sm:$0xf]  ;;  %v1360_v32 = vld [vmem:[#allocation2 + $0x50] sm:$0xf] }
   0xc   :  { %v1434_v31 = vld [vmem:[#allocation2 + $0xe8] sm:$0xf0]  ;;  %v1373_v33 = vor.u32 %v1909_v27, %v1370_v28  ;;  %v1908_v35 = vld [vmem:[#allocation2 + $0x54] sm:$0xf0]  ;;  %v1424_v36 = vld [vmem:[#allocation2 + $0xd0] sm:$0xf] }
   0xd   :  { %v1437_v34 = vor.u32 %v1925_v30, %v1434_v31  ;;  %v1924_v37 = vld [vmem:[#allocation2 + $0xd4] sm:$0xf0]  ;;  %300 = vmatpush.bf16.msra.mxu2 %v1369_v26  ;;  %v1361_v38 = vor.u32 %v1908_v35, %v1360_v32  ;;  %v1907_v39 = vld [vmem:[#allocation2 + $0x54] sm:$0xf]  ;;  %v1362_v40 = vld [vmem:[#allocation2 + $0x58] sm:$0xf0] }
   0xe   :  { %v1923_v41 = vld [vmem:[#allocation2 + $0xd4] sm:$0xf]  ;;  %1315 = vmatmul.msk.bf16.vlgmr.msra.gmra.mxu0 %vm55_vm1, %v42_v25  ;;  %1316 = vmatmul.msk.bf16.vlgmr.msra.gmra.mxu1 %vm55_vm1, %v42_v25  ;;  %v1426_v42 = vld [vmem:[#allocation2 + $0xd8] sm:$0xf0]  ;;  %v1352_v43 = vld [vmem:[#allocation2 + $0x40] sm:$0xf]  ;;  %v1425_v45 = vor.u32 %v1924_v37, %v1424_v36  ;;  %v1365_v47 = vor.u32 %v1907_v39, %v1362_v40 }
   0xf   :  { %327 = vmatpush.bf16.msrb.mxu0 %v1381_v15  ;;  %341 = vmatpush.bf16.msrb.mxu1 %v1445_v19  ;;  %v1906_v44 = vld [vmem:[#allocation2 + $0x44] sm:$0xf0]  ;;  %v1416_v46 = vld [vmem:[#allocation2 + $0xc0] sm:$0xf]  ;;  %v1429_v48 = vor.u32 %v1923_v41, %v1426_v42  ;;  %v1905_v50 = vld [vmem:[#allocation2 + $0x44] sm:$0xf] }
  0x10   :  { %314 = vmatpush.bf16.msra.mxu3 %v1433_v29  ;;  %v1922_v49 = vld [vmem:[#allocation2 + $0xc4] sm:$0xf0]  ;;  %v1354_v51 = vld [vmem:[#allocation2 + $0x48] sm:$0xf0]  ;;  %v1353_v52 = vor.u32 %v1906_v44, %v1352_v43  ;;  %v1921_v53 = vld [vmem:[#allocation2 + $0xc4] sm:$0xf] }
  0x11   :  { %301 = vmatpush.bf16.msra.mxu2 %v1361_v38  ;;  %v1418_v54 = vld [vmem:[#allocation2 + $0xc8] sm:$0xf0]  ;;  %v1417_v55 = vor.u32 %v1922_v49, %v1416_v46  ;;  %v1357_v56 = vor.u32 %v1905_v50, %v1354_v51  ;;  %v1344_v58 = vld [vmem:[#allocation2 + $0x30] sm:$0xf]  ;;  %v1904_v59 = vld [vmem:[#allocation2 + $0x34] sm:$0xf0] }
  0x12   :  { %v1421_v57 = vor.u32 %v1921_v53, %v1418_v54  ;;  %v1408_v60 = vld [vmem:[#allocation2 + $0xb0] sm:$0xf]  ;;  %v1345_v61 = vor.u32 %v1904_v59, %v1344_v58  ;;  %v1920_v62 = vld [vmem:[#allocation2 + $0xb4] sm:$0xf0]  ;;  %v1903_v63 = vld [vmem:[#allocation2 + $0x34] sm:$0xf] }
  0x13   :  { %328 = vmatpush.bf16.msrb.mxu0 %v1373_v33  ;;  %342 = vmatpush.bf16.msrb.mxu1 %v1437_v34  ;;  %v1346_v0 = vld [vmem:[#allocation2 + $0x38] sm:$0xf0]  ;;  %v1409_v1 = vor.u32 %v1920_v62, %v1408_v60  ;;  %v1919_v3 = vld [vmem:[#allocation2 + $0xb4] sm:$0xf]  ;;  %v1336_v6 = vld [vmem:[#allocation2 + $0x20] sm:$0xf] }
  0x14   :  { %315 = vmatpush.bf16.msra.mxu3 %v1425_v45  ;;  %v1349_v2 = vor.u32 %v1903_v63, %v1346_v0  ;;  %v1410_v4 = vld [vmem:[#allocation2 + $0xb8] sm:$0xf0]  ;;  %v1902_v7 = vld [vmem:[#allocation2 + $0x24] sm:$0xf0]  ;;  %v1400_v9 = vld [vmem:[#allocation2 + $0xa0] sm:$0xf] }
  0x15   :  { %302 = vmatpush.bf16.msra.mxu2 %v1353_v52  ;;  %v1413_v5 = vor.u32 %v1919_v3, %v1410_v4  ;;  %v1337_v8 = vor.u32 %v1902_v7, %v1336_v6  ;;  %v1918_v10 = vld [vmem:[#allocation2 + $0xa4] sm:$0xf0]  ;;  %v1901_v11 = vld [vmem:[#allocation2 + $0x24] sm:$0xf]  ;;  %v1338_v13 = vld [vmem:[#allocation2 + $0x28] sm:$0xf0] }
  0x16   :  { %v1401_v12 = vor.u32 %v1918_v10, %v1400_v9  ;;  %v1917_v14 = vld [vmem:[#allocation2 + $0xa4] sm:$0xf]  ;;  %v1402_v15 = vld [vmem:[#allocation2 + $0xa8] sm:$0xf0]  ;;  %v1341_v16 = vor.u32 %v1901_v11, %v1338_v13  ;;  %v1328_v18 = vld [vmem:[#allocation2 + $0x10] sm:$0xf] }
  0x17   :  { %329 = vmatpush.bf16.msrb.mxu0 %v1365_v47  ;;  %343 = vmatpush.bf16.msrb.mxu1 %v1429_v48  ;;  %v1405_v17 = vor.u32 %v1917_v14, %v1402_v15  ;;  %v1900_v19 = vld [vmem:[#allocation2 + $0x14] sm:$0xf0]  ;;  %v1392_v20 = vld [vmem:[#allocation2 + $0x90] sm:$0xf]  ;;  %v1899_v23 = vld [vmem:[#allocation2 + $0x14] sm:$0xf] }
  0x18   :  { %316 = vmatpush.bf16.msra.mxu3 %v1417_v55  ;;  %v1329_v21 = vor.u32 %v1900_v19, %v1328_v18  ;;  %v1916_v22 = vld [vmem:[#allocation2 + $0x94] sm:$0xf0]  ;;  %v1330_v24 = vld [vmem:[#allocation2 + $0x18] sm:$0xf0]  ;;  %v1915_v27 = vld [vmem:[#allocation2 + $0x94] sm:$0xf] }
  0x19   :  { %303 = vmatpush.bf16.msra.mxu2 %v1345_v61  ;;  %v1393_v25 = vor.u32 %v1916_v22, %v1392_v20  ;;  %v1333_v26 = vor.u32 %v1899_v23, %v1330_v24  ;;  %v1394_v28 = vld [vmem:[#allocation2 + $0x98] sm:$0xf0]  ;;  %v1320_v30 = vld [vmem:[#allocation2] sm:$0xf]  ;;  %v1898_v31 = vld [vmem:[#allocation2 + $0x4] sm:$0xf0] }
  0x1a   :  { %v1397_v29 = vor.u32 %v1915_v27, %v1394_v28  ;;  %v1384_v32 = vld [vmem:[#allocation2 + $0x80] sm:$0xf]  ;;  %v1321_v33 = vor.u32 %v1898_v31, %v1320_v30  ;;  %v1914_v34 = vld [vmem:[#allocation2 + $0x84] sm:$0xf0]  ;;  %v1897_v35 = vld [vmem:[#allocation2 + $0x4] sm:$0xf] }
  0x1b   :  { %330 = vmatpush.bf16.msrb.mxu0 %v1357_v56  ;;  %344 = vmatpush.bf16.msrb.mxu1 %v1421_v57  ;;  %v1322_v36 = vld [vmem:[#allocation2 + $0x8] sm:$0xf0]  ;;  %v1385_v37 = vor.u32 %v1914_v34, %v1384_v32  ;;  %v1913_v39 = vld [vmem:[#allocation2 + $0x84] sm:$0xf]  ;;  %v1569_v42 = vld [vmem:[#allocation2 + $0x1f0] sm:$0xf] }
  0x1c   :  { %317 = vmatpush.bf16.msra.mxu3 %v1409_v1  ;;  %v1325_v38 = vor.u32 %v1897_v35, %v1322_v36  ;;  %v1386_v40 = vld [vmem:[#allocation2 + $0x88] sm:$0xf0]  ;;  %v1960_v43 = vld [vmem:[#allocation2 + $0x1f4] sm:$0xf0]  ;;  %v1959_v44 = vld [vmem:[#allocation2 + $0x1f4] sm:$0xf] }
  0x1d   :  { %304 = vmatpush.bf16.msra.mxu2 %v1337_v8  ;;  %v1389_v41 = vor.u32 %v1913_v39, %v1386_v40  ;;  %v1570_v45 = vor.u32 %v1960_v43, %v1569_v42  ;;  %v1571_v46 = vld [vmem:[#allocation2 + $0x1f8] sm:$0xf0]  ;;  %v1561_v47 = vld [vmem:[#allocation2 + $0x1e0] sm:$0xf]  ;;  %v1958_v48 = vld [vmem:[#allocation2 + $0x1e4] sm:$0xf0] }
  0x1e   :  { %v1574_v49 = vor.u32 %v1959_v44, %v1571_v46  ;;  %v1957_v50 = vld [vmem:[#allocation2 + $0x1e4] sm:$0xf]  ;;  %v1563_v51 = vld [vmem:[#allocation2 + $0x1e8] sm:$0xf0]  ;;  %v1505_v52 = vld [vmem:[#allocation2 + $0x170] sm:$0xf]  ;;  %v1562_v53 = vor.u32 %v1958_v48, %v1561_v47 }
  0x1f   :  { %331 = vmatpush.bf16.msrb.mxu0 %v1349_v2  ;;  %345 = vmatpush.bf16.msrb.mxu1 %v1413_v5  ;;  %v1944_v54 = vld [vmem:[#allocation2 + $0x174] sm:$0xf0]  ;;  %v1943_v55 = vld [vmem:[#allocation2 + $0x174] sm:$0xf]  ;;  %v1507_v56 = vld [vmem:[#allocation2 + $0x178] sm:$0xf0]  ;;  %v1566_v57 = vor.u32 %v1957_v50, %v1563_v51 }
  0x20   :  { %318 = vmatpush.bf16.msra.mxu3 %v1401_v12  ;;  %v1506_v58 = vor.u32 %v1944_v54, %v1505_v52  ;;  %v1510_v59 = vor.u32 %v1943_v55, %v1507_v56  ;;  %v1553_v60 = vld [vmem:[#allocation2 + $0x1d0] sm:$0xf]  ;;  %v1956_v61 = vld [vmem:[#allocation2 + $0x1d4] sm:$0xf0]  ;;  %v1955_v62 = vld [vmem:[#allocation2 + $0x1d4] sm:$0xf] }
  0x21   :  { %305 = vmatpush.bf16.msra.mxu2 %v1329_v21  ;;  %v1555_v63 = vld [vmem:[#allocation2 + $0x1d8] sm:$0xf0]  ;;  %v1497_v0 = vld [vmem:[#allocation2 + $0x160] sm:$0xf]  ;;  %v1942_v1 = vld [vmem:[#allocation2 + $0x164] sm:$0xf0]  ;;  %v1554_v5 = vor.u32 %v1956_v61, %v1553_v60 }
  0x22   :  { %v1498_v2 = vor.u32 %v1942_v1, %v1497_v0  ;;  %v1941_v3 = vld [vmem:[#allocation2 + $0x164] sm:$0xf]  ;;  %v1499_v4 = vld [vmem:[#allocation2 + $0x168] sm:$0xf0]  ;;  %v1558_v7 = vor.u32 %v1955_v62, %v1555_v63  ;;  %v1545_v8 = vld [vmem:[#allocation2 + $0x1c0] sm:$0xf] }
  0x23   :  { %332 = vmatpush.bf16.msrb.mxu0 %v1341_v16  ;;  %346 = vmatpush.bf16.msrb.mxu1 %v1405_v17  ;;  %v1502_v6 = vor.u32 %v1941_v3, %v1499_v4  ;;  %v1954_v9 = vld [vmem:[#allocation2 + $0x1c4] sm:$0xf0]  ;;  %v1953_v10 = vld [vmem:[#allocation2 + $0x1c4] sm:$0xf]  ;;  %v1547_v11 = vld [vmem:[#allocation2 + $0x1c8] sm:$0xf0] }
  0x24   :  { %319 = vmatpush.bf16.msra.mxu3 %v1393_v25  ;;  %v1546_v12 = vor.u32 %v1954_v9, %v1545_v8  ;;  %v1550_v13 = vor.u32 %v1953_v10, %v1547_v11  ;;  %v44_v14 = vld [vmem:[%s2201_s4] ss:$8 sm:$0x3]  ;;  %v1489_v31 = vld [vmem:[#allocation2 + $0x150] sm:$0xf]  ;;  %vm1307_vm2 = vcmask 31744  }
  0x25   :  { %306 = vmatpush.bf16.msra.mxu2 %v1321_v33  ;;  %v46_v17 = vperm.slane %v44_v14, 0  ;;  %v47_v18 = vperm.slane %v44_v14, 1  ;;  %v1940_v32 = vld [vmem:[#allocation2 + $0x154] sm:$0xf0]  ;;  %v1939_v33 = vld [vmem:[#allocation2 + $0x154] sm:$0xf] }
  0x26   :  { %v1490_v34 = vor.u32 %v1940_v32, %v1489_v31  ;;  %v1491_v35 = vld [vmem:[#allocation2 + $0x158] sm:$0xf0]  ;;  %v1951_v39 = vld [vmem:[#allocation2 + $0x1b4] sm:$0xf]  ;;  %v1481_v43 = vld [vmem:[#allocation2 + $0x140] sm:$0xf] }
  0x27   :  { %333 = vmatpush.bf16.msrb.mxu0 %v1333_v26  ;;  %347 = vmatpush.bf16.msrb.mxu1 %v1397_v29  ;;  %v1494_v36 = vor.u32 %v1939_v33, %v1491_v35  ;;  %v1938_v44 = vld [vmem:[#allocation2 + $0x144] sm:$0xf0]  ;;  %v1483_v47 = vld [vmem:[#allocation2 + $0x148] sm:$0xf0]  ;;  %v1949_v51 = vld [vmem:[#allocation2 + $0x1a4] sm:$0xf] }
  0x28   :  { %320 = vmatpush.bf16.msra.mxu3 %v1385_v37  ;;  %v1537_v37 = vld [vmem:[#allocation2 + $0x1b0] sm:$0xf]  ;;  %v1482_v46 = vor.u32 %v1938_v44, %v1481_v43  ;;  %v1950_v50 = vld [vmem:[#allocation2 + $0x1a4] sm:$0xf0]  ;;  %v1936_v56 = vld [vmem:[#allocation2 + $0x134] sm:$0xf0] }
  0x29   :  { %561 = vmatpush.bf16.msrb.mxu2 %v1506_v58  ;;  %v1473_v55 = vld [vmem:[#allocation2 + $0x130] sm:$0xf]  ;;  %v1935_v58 = vld [vmem:[#allocation2 + $0x134] sm:$0xf]  ;;  %v1948_v62 = vld [vmem:[#allocation2 + $0x194] sm:$0xf0] }
  0x2a   :  { %v1521_v61 = vld [vmem:[#allocation2 + $0x190] sm:$0xf]  ;;  %v1947_v63 = vld [vmem:[#allocation2 + $0x194] sm:$0xf]  ;;  %v1523_v1 = vld [vmem:[#allocation2 + $0x198] sm:$0xf0] }
  0x2b   :  { %334 = vmatpush.bf16.msrb.mxu0 %v1325_v38  ;;  %348 = vmatpush.bf16.msrb.mxu1 %v1389_v41  ;;  %v1952_v38 = vld [vmem:[#allocation2 + $0x1b4] sm:$0xf0]  ;;  %v1539_v41 = vld [vmem:[#allocation2 + $0x1b8] sm:$0xf0]  ;;  %v1522_v0 = vor.u32 %v1948_v62, %v1521_v61  ;;  %v1465_v3 = vld [vmem:[#allocation2 + $0x120] sm:$0xf] }
  0x2c   :  { %575 = vmatpush.bf16.msrb.mxu3 %v1570_v45  ;;  %v1538_v40 = vor.u32 %v1952_v38, %v1537_v37  ;;  %v1542_v42 = vor.u32 %v1951_v39, %v1539_v41  ;;  %v1937_v45 = vld [vmem:[#allocation2 + $0x144] sm:$0xf]  ;;  %v1934_v4 = vld [vmem:[#allocation2 + $0x124] sm:$0xf0]  ;;  %v1513_v9 = vld [vmem:[#allocation2 + $0x180] sm:$0xf] }
  0x2d   :  { %562 = vmatpush.bf16.msrb.mxu2 %v1498_v2  ;;  %v1486_v48 = vor.u32 %v1937_v45, %v1483_v47  ;;  %v1526_v2 = vor.u32 %v1947_v63, %v1523_v1  ;;  %v1946_v10 = vld [vmem:[#allocation2 + $0x184] sm:$0xf0]  ;;  %v1945_v11 = vld [vmem:[#allocation2 + $0x184] sm:$0xf]  ;;  %v1700_v31 = vld [vmem:[#allocation2 + $0x2f8] sm:$0xf0] }
  0x2e   :  { %v1690_v32 = vld [vmem:[#allocation2 + $0x2e0] sm:$0xf]  ;;  %v1990_v33 = vld [vmem:[#allocation2 + $0x2e4] sm:$0xf0]  ;;  %v1989_v35 = vld [vmem:[#allocation2 + $0x2e4] sm:$0xf] }
  0x2f   :  { %603 = vmatpush.bf16.msra.mxu1 %v1574_v49  ;;  %589 = vmatpush.bf16.msra.mxu0 %v1510_v59  ;;  %v1529_v49 = vld [vmem:[#allocation2 + $0x1a0] sm:$0xf]  ;;  %v1475_v59 = vld [vmem:[#allocation2 + $0x138] sm:$0xf0]  ;;  %v1634_v37 = vld [vmem:[#allocation2 + $0x270] sm:$0xf]  ;;  %v1691_v38 = vor.u32 %v1990_v33, %v1690_v32 }
  0x30   :  { %576 = vmatpush.bf16.msrb.mxu3 %v1562_v53  ;;  %v1530_v52 = vor.u32 %v1950_v50, %v1529_v49  ;;  %v1531_v53 = vld [vmem:[#allocation2 + $0x1a8] sm:$0xf0]  ;;  %v1478_v60 = vor.u32 %v1935_v58, %v1475_v59  ;;  %v1976_v39 = vld [vmem:[#allocation2 + $0x274] sm:$0xf0]  ;;  %v1636_v41 = vld [vmem:[#allocation2 + $0x278] sm:$0xf0] }
  0x31   :  { %563 = vmatpush.bf16.msrb.mxu2 %v1490_v34  ;;  %v1534_v54 = vor.u32 %v1949_v51, %v1531_v53  ;;  %v1635_v43 = vor.u32 %v1976_v39, %v1634_v37  ;;  %v1317_v45 = vld [vmem:[%s2201_s4 + $0x1] ss:$8 sm:$0x3]  ;;  %v1983_v33 = vld [vmem:[#allocation2 + $0x2b4] sm:$0xf] }
  0x32   :  { %v1970_v37 = vld [vmem:[#allocation2 + $0x244] sm:$0xf0] }
  0x33   :  { %604 = vmatpush.bf16.msra.mxu1 %v1566_v57  ;;  %590 = vmatpush.bf16.msra.mxu0 %v1502_v6  ;;  %v1474_v57 = vor.u32 %v1936_v56, %v1473_v55  ;;  %v1466_v6 = vor.u32 %v1934_v4, %v1465_v3 }
  0x34   :  { %577 = vmatpush.bf16.msrb.mxu3 %v1554_v5  ;;  %v1933_v5 = vld [vmem:[#allocation2 + $0x124] sm:$0xf] }
  0x35   :  { %564 = vmatpush.bf16.msrb.mxu2 %v1482_v46 }
  0x37   :  { %605 = vmatpush.bf16.msra.mxu1 %v1558_v7  ;;  %591 = vmatpush.bf16.msra.mxu0 %v1494_v36  ;;  %v1467_v7 = vld [vmem:[#allocation2 + $0x128] sm:$0xf0] }
  0x38   :  { %578 = vmatpush.bf16.msrb.mxu3 %v1546_v12  ;;  %v1470_v8 = vor.u32 %v1933_v5, %v1467_v7  ;;  %v1514_v12 = vor.u32 %v1946_v10, %v1513_v9  ;;  %v1692_v36 = vld [vmem:[#allocation2 + $0x2e8] sm:$0xf0]  ;;  %v1988_v7 = vld [vmem:[#allocation2 + $0x2d4] sm:$0xf0]  ;;  %v1684_v10 = vld [vmem:[#allocation2 + $0x2d8] sm:$0xf0] }
  0x39   :  { %565 = vmatpush.bf16.msrb.mxu2 %v1474_v57 }
  0x3b   :  { %606 = vmatpush.bf16.msra.mxu1 %v1550_v13  ;;  %592 = vmatpush.bf16.msra.mxu0 %v1486_v48  ;;  %v1515_v13 = vld [vmem:[#allocation2 + $0x188] sm:$0xf0]  ;;  %v136_v48 = vperm.slane %v1317_v45, 1 }
  0x3c   :  { %579 = vmatpush.bf16.msrb.mxu3 %v1538_v40  ;;  %v1518_v14 = vor.u32 %v1945_v11, %v1515_v13  ;;  %v1975_v40 = vld [vmem:[#allocation2 + $0x274] sm:$0xf]  ;;  %v1974_v13 = vld [vmem:[#allocation2 + $0x264] sm:$0xf0] }
  0x3d   :  { %566 = vmatpush.bf16.msrb.mxu2 %v1466_v6  ;;  %v1639_v44 = vor.u32 %v1975_v40, %v1636_v41  ;;  %v1682_v6 = vld [vmem:[#allocation2 + $0x2d0] sm:$0xf]  ;;  %v1612_v40 = vld [vmem:[#allocation2 + $0x248] sm:$0xf0] }
  0x3e   :  { %v1683_v9 = vor.u32 %v1988_v7, %v1682_v6  ;;  %v1644_v6 = vld [vmem:[#allocation2 + $0x288] sm:$0xf0] }
  0x3f   :  { %607 = vmatpush.bf16.msra.mxu1 %v1542_v42  ;;  %593 = vmatpush.bf16.msra.mxu0 %v1478_v60  ;;  %v1695_v42 = vor.u32 %v1989_v35, %v1692_v36  ;;  %v1610_v36 = vld [vmem:[#allocation2 + $0x240] sm:$0xf] }
  0x40   :  { %580 = vmatpush.bf16.msrb.mxu3 %v1530_v52  ;;  %v135_v52 = vperm.slane %v1317_v45, 0  ;;  %v1611_v39 = vor.u32 %v1970_v37, %v1610_v36 }
  0x43   :  { %608 = vmatpush.bf16.msra.mxu1 %v1534_v54  ;;  %594 = vmatpush.bf16.msra.mxu0 %v1470_v8  ;;  %v1987_v8 = vld [vmem:[#allocation2 + $0x2d4] sm:$0xf] }
  0x44   :  { %581 = vmatpush.bf16.msrb.mxu3 %v1522_v0  ;;  %v1687_v11 = vor.u32 %v1987_v8, %v1684_v10  ;;  %v1586_v8 = vld [vmem:[#allocation2 + $0x210] sm:$0xf]  ;;  %v1963_v10 = vld [vmem:[#allocation2 + $0x214] sm:$0xf] }
  0x47   :  { %609 = vmatpush.bf16.msra.mxu1 %v1526_v2 }
  0x48   :  { %582 = vmatpush.bf16.msrb.mxu3 %v1514_v12  ;;  %v1626_v12 = vld [vmem:[#allocation2 + $0x260] sm:$0xf] }
  0x4b   :  { %610 = vmatpush.bf16.msra.mxu1 %v1518_v14  ;;  %v1973_v14 = vld [vmem:[#allocation2 + $0x264] sm:$0xf] }
  0x8b   :  { %v75_v15 = vpop.f32.mrf.mxu0  ;;  %v89_v16 = vpop.f32.mrf.mxu1 }
  0x8c   :  { %v76_v19 = vadd.f32 %v75_v15, %v46_v17  ;;  %v90_v20 = vadd.f32 %v89_v16, %v47_v18  ;;  %v1457_v15 = vld [vmem:[#allocation2 + $0x110] sm:$0xf]  ;;  %v1932_v16 = vld [vmem:[#allocation2 + $0x114] sm:$0xf0] }
  0x8e   :  { %v94_v25 = vmax.f32 %v76_v19, 0.0  ;;  %v95_v26 = vmax.f32 %v90_v20, 0.0  ;;  %v1459_v19 = vld [vmem:[#allocation2 + $0x118] sm:$0xf0] }
  0x93   :  { %v77_v21 = vpop.f32.mrf.mxu0  ;;  %v91_v22 = vpop.f32.mrf.mxu1 }
  0x94   :  { %v78_v23 = vadd.f32 %v77_v21, %v46_v17  ;;  %v92_v24 = vadd.f32 %v91_v22, %v47_v18  ;;  %v1931_v17 = vld [vmem:[#allocation2 + $0x114] sm:$0xf]  ;;  %v1458_v18 = vor.u32 %v1932_v16, %v1457_v15  ;;  %v1449_v21 = vld [vmem:[#allocation2 + $0x100] sm:$0xf]  ;;  %v1930_v22 = vld [vmem:[#allocation2 + $0x104] sm:$0xf0]  ;;  %v1627_v15 = vor.u32 %v1974_v13, %v1626_v12 }
  0x95   :  { %v1462_v20 = vor.u32 %v1931_v17, %v1459_v19  ;;  %v1628_v16 = vld [vmem:[#allocation2 + $0x268] sm:$0xf0]  ;;  %v1674_v17 = vld [vmem:[#allocation2 + $0x2c0] sm:$0xf]  ;;  %v1588_v12 = vld [vmem:[#allocation2 + $0x218] sm:$0xf0] }
  0x96   :  { %v96_v27 = vmax.f32 %v78_v23, 0.0  ;;  %v97_v28 = vmax.f32 %v92_v24, 0.0  ;;  %567 = vmatpush.bf16.msrb.mxu2 %v1458_v18  ;;  %v1929_v23 = vld [vmem:[#allocation2 + $0x104] sm:$0xf]  ;;  %v1450_v24 = vor.u32 %v1930_v22, %v1449_v21  ;;  %v1986_v18 = vld [vmem:[#allocation2 + $0x2c4] sm:$0xf0]  ;;  %v1631_v19 = vor.u32 %v1973_v14, %v1628_v16 }
  0x97   :  { %595 = vmatpush.bf16.msra.mxu0 %v1462_v20  ;;  %v1675_v20 = vor.u32 %v1986_v18, %v1674_v17  ;;  %v1985_v21 = vld [vmem:[#allocation2 + $0x2c4] sm:$0xf]  ;;  %v1676_v22 = vld [vmem:[#allocation2 + $0x2c8] sm:$0xf0]  ;;  %v1591_v13 = vor.u32 %v1963_v10, %v1588_v12  ;;  %v1578_v14 = vld [vmem:[#allocation2 + $0x200] sm:$0xf] }
  0x98   :  { %v98_v29 = vpack.c.bf16 %v96_v27, %v94_v25  ;;  %v99_v30 = vpack.c.bf16 %v97_v28, %v95_v26  ;;  %v1451_v25 = vld [vmem:[#allocation2 + $0x108] sm:$0xf0]  ;;  %v1698_v27 = vld [vmem:[#allocation2 + $0x2f0] sm:$0xf]  ;;  %v1992_v28 = vld [vmem:[#allocation2 + $0x2f4] sm:$0xf0] }
  0x99   :  { %v1454_v26 = vor.u32 %v1929_v23, %v1451_v25  ;;  %v1679_v23 = vor.u32 %v1985_v21, %v1676_v22  ;;  %v1972_v25 = vld [vmem:[#allocation2 + $0x254] sm:$0xf0]  ;;  %v1961_v16 = vld [vmem:[#allocation2 + $0x204] sm:$0xf]  ;;  %v1580_v18 = vld [vmem:[#allocation2 + $0x208] sm:$0xf0] }
  0x9a   :  { %307 = vmatmul.bf16.vlgmr.msra.gmra.mxu2 %v98_v29  ;;  %321 = vmatmul.bf16.vlgmr.msra.gmra.mxu3 %v99_v30  ;;  %v2024_v21 = vld [vmem:[#allocation2 + $0x3f4] sm:$0xf0]  ;;  %v2023_v22 = vld [vmem:[#allocation2 + $0x3f4] sm:$0xf]  ;;  %v1803_v10 = vld [vmem:[#allocation2 + $0x3c0] sm:$0xf] }
  0x9b   :  { %335 = vmatmul.bf16.vlgmr.msrb.gmra.mxu0 %v98_v29  ;;  %349 = vmatmul.bf16.vlgmr.msrb.gmra.mxu1 %v99_v30  ;;  %v1991_v29 = vld [vmem:[#allocation2 + $0x2f4] sm:$0xf]  ;;  %v1699_v30 = vor.u32 %v1992_v28, %v1698_v27  ;;  %v1620_v28 = vld [vmem:[#allocation2 + $0x258] sm:$0xf0] }
  0x9c   :  { %568 = vmatpush.bf16.msrb.mxu2 %v1450_v24  ;;  %596 = vmatpush.bf16.msra.mxu0 %v1454_v26  ;;  %v1703_v34 = vor.u32 %v1991_v29, %v1700_v31  ;;  %v1618_v24 = vld [vmem:[#allocation2 + $0x250] sm:$0xf]  ;;  %v1971_v26 = vld [vmem:[#allocation2 + $0x254] sm:$0xf]  ;;  %v1984_v31 = vld [vmem:[#allocation2 + $0x2b4] sm:$0xf0] }
  0x9d   :  { %837 = vmatpush.bf16.msra.mxu3 %v1699_v30  ;;  %v1619_v27 = vor.u32 %v1972_v25, %v1618_v24  ;;  %v1623_v29 = vor.u32 %v1971_v26, %v1620_v28  ;;  %v1666_v30 = vld [vmem:[#allocation2 + $0x2b0] sm:$0xf]  ;;  %v1829_v24 = vld [vmem:[#allocation2 + $0x3f8] sm:$0xf0]  ;;  %v1819_v25 = vld [vmem:[#allocation2 + $0x3e0] sm:$0xf] }
  0x9e   :  { %865 = vmatpush.bf16.msrb.mxu1 %v1703_v34  ;;  %v1667_v32 = vor.u32 %v1984_v31, %v1666_v30  ;;  %v1668_v34 = vld [vmem:[#allocation2 + $0x2b8] sm:$0xf0]  ;;  %v2022_v26 = vld [vmem:[#allocation2 + $0x3e4] sm:$0xf0]  ;;  %v2021_v28 = vld [vmem:[#allocation2 + $0x3e4] sm:$0xf] }
  0x9f   :  { %v1671_v35 = vor.u32 %v1983_v33, %v1668_v34  ;;  %v1763_v30 = vld [vmem:[#allocation2 + $0x370] sm:$0xf]  ;;  %v1820_v31 = vor.u32 %v2022_v26, %v1819_v25  ;;  %v2007_v33 = vld [vmem:[#allocation2 + $0x374] sm:$0xf]  ;;  %v1765_v34 = vld [vmem:[#allocation2 + $0x378] sm:$0xf0] }
  0xa0   :  { %823 = vmatpush.bf16.msra.mxu2 %v1635_v43  ;;  %851 = vmatpush.bf16.msrb.mxu0 %v1639_v44  ;;  %v1982_v43 = vld [vmem:[#allocation2 + $0x2a4] sm:$0xf0]  ;;  %v1981_v44 = vld [vmem:[#allocation2 + $0x2a4] sm:$0xf]  ;;  %v1768_v37 = vor.u32 %v2007_v33, %v1765_v34  ;;  %v2015_v26 = vld [vmem:[#allocation2 + $0x3b4] sm:$0xf] }
  0xa1   :  { %838 = vmatpush.bf16.msra.mxu3 %v1691_v38  ;;  %v1969_v38 = vld [vmem:[#allocation2 + $0x244] sm:$0xf]  ;;  %v1741_v33 = vld [vmem:[#allocation2 + $0x348] sm:$0xf0] }
  0xa2   :  { %866 = vmatpush.bf16.msrb.mxu1 %v1695_v42  ;;  %v1615_v41 = vor.u32 %v1969_v38, %v1612_v40  ;;  %v1658_v42 = vld [vmem:[#allocation2 + $0x2a0] sm:$0xf] }
  0xa3   :  { %v1659_v45 = vor.u32 %v1982_v43, %v1658_v42  ;;  %v1446_v38 = vld [vmem:[%s2201_s4 + $0x2] ss:$8 sm:$0x3] }
  0xa4   :  { %824 = vmatpush.bf16.msra.mxu2 %v1627_v15  ;;  %852 = vmatpush.bf16.msrb.mxu0 %v1631_v19  ;;  %v1962_v15 = vld [vmem:[#allocation2 + $0x204] sm:$0xf0]  ;;  %v1583_v19 = vor.u32 %v1961_v16, %v1580_v18  ;;  %v2004_v18 = vld [vmem:[#allocation2 + $0x354] sm:$0xf0] }
  0xa5   :  { %839 = vmatpush.bf16.msra.mxu3 %v1683_v9  ;;  %v1964_v9 = vld [vmem:[#allocation2 + $0x214] sm:$0xf0]  ;;  %v1579_v17 = vor.u32 %v1962_v15, %v1578_v14  ;;  %v2017_v14 = vld [vmem:[#allocation2 + $0x3c4] sm:$0xf]  ;;  %v1805_v15 = vld [vmem:[#allocation2 + $0x3c8] sm:$0xf0] }
  0xa6   :  { %867 = vmatpush.bf16.msrb.mxu1 %v1687_v11  ;;  %v1587_v11 = vor.u32 %v1964_v9, %v1586_v8  ;;  %v1757_v9 = vld [vmem:[#allocation2 + $0x368] sm:$0xf0]  ;;  %v1808_v16 = vor.u32 %v2017_v14, %v1805_v15  ;;  %v2032_v14 = vld [vmem:[%s2200_s3 + $0x38] sm:$0xff]  ;;  %v2039_v15 = vld [vmem:[%s2200_s3 + $0x70] sm:$0xff] }
  0xa8   :  { %825 = vmatpush.bf16.msra.mxu2 %v1619_v27  ;;  %853 = vmatpush.bf16.msrb.mxu0 %v1623_v29  ;;  %v1832_v27 = vor.u32 %v2023_v22, %v1829_v24  ;;  %v1821_v29 = vld [vmem:[#allocation2 + $0x3e8] sm:$0xf0]  ;;  %v2016_v24 = vld [vmem:[#allocation2 + $0x3b4] sm:$0xf0] }
  0xa9   :  { %840 = vmatpush.bf16.msra.mxu3 %v1675_v20  ;;  %v1827_v20 = vld [vmem:[#allocation2 + $0x3f0] sm:$0xf] }
  0xaa   :  { %868 = vmatpush.bf16.msrb.mxu1 %v1679_v23  ;;  %v1828_v23 = vor.u32 %v2024_v21, %v1827_v20  ;;  %v1749_v21 = vld [vmem:[#allocation2 + $0x358] sm:$0xf0] }
  0xac   :  { %826 = vmatpush.bf16.msra.mxu2 %v1611_v39  ;;  %854 = vmatpush.bf16.msrb.mxu0 %v1615_v41  ;;  %v398_v41 = vperm.slane %v1446_v38, 1 }
  0xad   :  { %841 = vmatpush.bf16.msra.mxu3 %v1667_v32  ;;  %v2008_v32 = vld [vmem:[#allocation2 + $0x374] sm:$0xf0] }
  0xae   :  { %869 = vmatpush.bf16.msrb.mxu1 %v1671_v35  ;;  %v1824_v35 = vor.u32 %v2021_v28, %v1821_v29  ;;  %v1764_v36 = vor.u32 %v2008_v32, %v1763_v30  ;;  %v1739_v29 = vld [vmem:[#allocation2 + $0x340] sm:$0xf]  ;;  %v2002_v30 = vld [vmem:[#allocation2 + $0x344] sm:$0xf0] }
  0xaf   :  { %v1740_v32 = vor.u32 %v2002_v30, %v1739_v29 }
  0xb1   :  { %842 = vmatpush.bf16.msra.mxu3 %v1659_v45  ;;  %v397_v45 = vperm.slane %v1446_v38, 0 }
 0x118   :  { %v336_v46 = vpop.f32.mrf.mxu0  ;;  %v350_v47 = vpop.f32.mrf.mxu1 }
 0x119   :  { %v337_v49 = vadd.f32 %v336_v46, %v136_v48  ;;  %v1660_v46 = vld [vmem:[#allocation2 + $0x2a8] sm:$0xf0] }
 0x11b   :  { %v351_v54 = vadd.f32 %v350_v47, %v337_v49  ;;  %v1663_v47 = vor.u32 %v1981_v44, %v1660_v46  ;;  %v1968_v49 = vld [vmem:[#allocation2 + $0x234] sm:$0xf0] }
 0x11d   :  { %v308_v50 = vpop.f32.mrf.mxu2  ;;  %v322_v51 = vpop.f32.mrf.mxu3  ;;  %v356_v59 = vmax.f32 %v351_v54, 0.0  ;;  %870 = vmatpush.bf16.msrb.mxu1 %v1663_v47  ;;  %v1650_v54 = vld [vmem:[#allocation2 + $0x290] sm:$0xf] }
 0x11e   :  { %v309_v56 = vadd.f32 %v308_v50, %v135_v52  ;;  %v1967_v50 = vld [vmem:[#allocation2 + $0x234] sm:$0xf] }
 0x120   :  { %v338_v53 = vpop.f32.mrf.mxu0  ;;  %v352_v57 = vpop.f32.mrf.mxu1  ;;  %v323_v62 = vadd.f32 %v322_v51, %v309_v56  ;;  %v1979_v56 = vld [vmem:[#allocation2 + $0x294] sm:$0xf] }
 0x121   :  { %v339_v55 = vadd.f32 %v338_v53, %v136_v48  ;;  %v1602_v48 = vld [vmem:[#allocation2 + $0x230] sm:$0xf] }
 0x122   :  { %v355_v3 = vmax.f32 %v323_v62, 0.0  ;;  %v1603_v51 = vor.u32 %v1968_v49, %v1602_v48  ;;  %v1965_v62 = vld [vmem:[#allocation2 + $0x224] sm:$0xf] }
 0x123   :  { %v353_v58 = vadd.f32 %v352_v57, %v339_v55  ;;  %v1980_v55 = vld [vmem:[#allocation2 + $0x294] sm:$0xf0] }
 0x124   :  { %827 = vmatpush.bf16.msra.mxu2 %v1603_v51  ;;  %v1651_v57 = vor.u32 %v1980_v55, %v1650_v54 }
 0x125   :  { %v358_v60 = vmax.f32 %v353_v58, 0.0  ;;  %v310_v61 = vpop.f32.mrf.mxu2  ;;  %v324_v1 = vpop.f32.mrf.mxu3  ;;  %v1652_v58 = vld [vmem:[#allocation2 + $0x298] sm:$0xf0] }
 0x126   :  { %v311_v63 = vadd.f32 %v310_v61, %v135_v52  ;;  %v1604_v52 = vld [vmem:[#allocation2 + $0x238] sm:$0xf0]  ;;  %v1966_v61 = vld [vmem:[#allocation2 + $0x224] sm:$0xf0]  ;;  %843 = vmatpush.bf16.msra.mxu3 %v1651_v57 }
 0x127   :  { %v360_v0 = vpack.c.bf16 %v358_v60, %v356_v59  ;;  %v1607_v53 = vor.u32 %v1967_v50, %v1604_v52  ;;  %v1655_v59 = vor.u32 %v1979_v56, %v1652_v58  ;;  %v1594_v60 = vld [vmem:[#allocation2 + $0x220] sm:$0xf] }
 0x128   :  { %v325_v2 = vadd.f32 %v324_v1, %v311_v63  ;;  %v1595_v63 = vor.u32 %v1966_v61, %v1594_v60 }
 0x129   :  { %583 = vmatmul.bf16.vlgmr.msrb.gmra.mxu3 %v360_v0  ;;  %611 = vmatmul.bf16.vlgmr.msra.gmra.mxu1 %v360_v0  ;;  %v1596_v0 = vld [vmem:[#allocation2 + $0x228] sm:$0xf0] }
 0x12a   :  { %v357_v4 = vmax.f32 %v325_v2, 0.0  ;;  %855 = vmatpush.bf16.msrb.mxu0 %v1607_v53  ;;  %871 = vmatpush.bf16.msrb.mxu1 %v1655_v59  ;;  %v1599_v1 = vor.u32 %v1965_v62, %v1596_v0  ;;  %v1642_v2 = vld [vmem:[#allocation2 + $0x280] sm:$0xf]  ;;  %v2020_v0 = vld [vmem:[#allocation2 + $0x3d4] sm:$0xf0] }
 0x12b   :  { %828 = vmatpush.bf16.msra.mxu2 %v1595_v63  ;;  %v1811_v63 = vld [vmem:[#allocation2 + $0x3d0] sm:$0xf] }
 0x12c   :  { %v359_v5 = vpack.c.bf16 %v357_v4, %v355_v3  ;;  %v1978_v3 = vld [vmem:[#allocation2 + $0x284] sm:$0xf0]  ;;  %v1977_v4 = vld [vmem:[#allocation2 + $0x284] sm:$0xf] }
 0x12d   :  { %v1647_v7 = vor.u32 %v1977_v4, %v1644_v6  ;;  %v2006_v6 = vld [vmem:[#allocation2 + $0x364] sm:$0xf0] }
 0x12e   :  { %569 = vmatmul.bf16.vlgmr.msrb.gmra.mxu2 %v359_v5  ;;  %597 = vmatmul.bf16.vlgmr.msra.gmra.mxu0 %v359_v5  ;;  %v1643_v5 = vor.u32 %v1978_v3, %v1642_v2  ;;  %v1812_v2 = vor.u32 %v2020_v0, %v1811_v63  ;;  %v1813_v3 = vld [vmem:[#allocation2 + $0x3d8] sm:$0xf0]  ;;  %v1773_v63 = vld [vmem:[#allocation2 + $0x388] sm:$0xf0] }
 0x12f   :  { %856 = vmatpush.bf16.msrb.mxu0 %v1599_v1  ;;  %872 = vmatpush.bf16.msrb.mxu1 %v1647_v7  ;;  %v2019_v1 = vld [vmem:[#allocation2 + $0x3d4] sm:$0xf]  ;;  %v2005_v7 = vld [vmem:[#allocation2 + $0x364] sm:$0xf] }
 0x130   :  { %844 = vmatpush.bf16.msra.mxu3 %v1643_v5  ;;  %829 = vmatpush.bf16.msra.mxu2 %v1587_v11  ;;  %v1816_v4 = vor.u32 %v2019_v1, %v1813_v3  ;;  %v1755_v5 = vld [vmem:[#allocation2 + $0x360] sm:$0xf]  ;;  %v2018_v11 = vld [vmem:[#allocation2 + $0x3c4] sm:$0xf0]  ;;  %v1760_v12 = vor.u32 %v2005_v7, %v1757_v9  ;;  %v1715_v1 = vld [vmem:[#allocation2 + $0x310] sm:$0xf] }
 0x131   :  { %v1756_v8 = vor.u32 %v2006_v6, %v1755_v5  ;;  %v1995_v3 = vld [vmem:[#allocation2 + $0x314] sm:$0xf]  ;;  %v1717_v5 = vld [vmem:[#allocation2 + $0x318] sm:$0xf0]  ;;  %v1707_v7 = vld [vmem:[#allocation2 + $0x300] sm:$0xf] }
 0x132   :  { %v1720_v6 = vor.u32 %v1995_v3, %v1717_v5  ;;  %v1993_v9 = vld [vmem:[#allocation2 + $0x304] sm:$0xf] }
 0x133   :  { %857 = vmatpush.bf16.msrb.mxu0 %v1591_v13  ;;  %1127 = vmatpush.bf16.msra.mxu1 %v1832_v27  ;;  %v1804_v13 = vor.u32 %v2018_v11, %v1803_v10  ;;  %v1797_v27 = vld [vmem:[#allocation2 + $0x3b8] sm:$0xf0]  ;;  %v1709_v11 = vld [vmem:[#allocation2 + $0x308] sm:$0xf0] }
 0x134   :  { %830 = vmatpush.bf16.msra.mxu2 %v1579_v17  ;;  %1099 = vmatpush.bf16.msrb.mxu3 %v1828_v23  ;;  %v1747_v17 = vld [vmem:[#allocation2 + $0x350] sm:$0xf]  ;;  %v1800_v28 = vor.u32 %v2015_v26, %v1797_v27 }
 0x135   :  { %v1748_v20 = vor.u32 %v2004_v18, %v1747_v17  ;;  %v1795_v23 = vld [vmem:[#allocation2 + $0x3b0] sm:$0xf] }
 0x136   :  { %v1796_v25 = vor.u32 %v2016_v24, %v1795_v23 }
 0x137   :  { %858 = vmatpush.bf16.msrb.mxu0 %v1583_v19  ;;  %1128 = vmatpush.bf16.msra.mxu1 %v1824_v35  ;;  %v2003_v19 = vld [vmem:[#allocation2 + $0x354] sm:$0xf]  ;;  %v1787_v35 = vld [vmem:[#allocation2 + $0x3a0] sm:$0xf] }
 0x138   :  { %1085 = vmatpush.bf16.msrb.mxu2 %v1764_v36  ;;  %1100 = vmatpush.bf16.msrb.mxu3 %v1820_v31  ;;  %v1752_v22 = vor.u32 %v2003_v19, %v1749_v21  ;;  %v2001_v31 = vld [vmem:[#allocation2 + $0x344] sm:$0xf]  ;;  %v2014_v36 = vld [vmem:[#allocation2 + $0x3a4] sm:$0xf0] }
 0x139   :  { %v1744_v34 = vor.u32 %v2001_v31, %v1741_v33  ;;  %v1788_v38 = vor.u32 %v2014_v36, %v1787_v35 }
 0x13b   :  { %1113 = vmatpush.bf16.msra.mxu0 %v1768_v37  ;;  %1129 = vmatpush.bf16.msra.mxu1 %v1816_v4  ;;  %v2013_v37 = vld [vmem:[#allocation2 + $0x3a4] sm:$0xf] }
 0x13c   :  { %1101 = vmatpush.bf16.msrb.mxu3 %v1812_v2  ;;  %1086 = vmatpush.bf16.msrb.mxu2 %v1756_v8  ;;  %v1996_v2 = vld [vmem:[#allocation2 + $0x314] sm:$0xf0]  ;;  %v1994_v8 = vld [vmem:[#allocation2 + $0x304] sm:$0xf0] }
 0x13d   :  { %v1716_v4 = vor.u32 %v1996_v2, %v1715_v1  ;;  %v1708_v10 = vor.u32 %v1994_v8, %v1707_v7 }
 0x13f   :  { %1114 = vmatpush.bf16.msra.mxu0 %v1760_v12  ;;  %1130 = vmatpush.bf16.msra.mxu1 %v1808_v16  ;;  %v1712_v12 = vor.u32 %v1993_v9, %v1709_v11  ;;  %v1575_v16 = vld [vmem:[%s2201_s4 + $0x3] ss:$8 sm:$0x3] }
 0x140   :  { %1102 = vmatpush.bf16.msrb.mxu3 %v1804_v13  ;;  %1087 = vmatpush.bf16.msrb.mxu2 %v1748_v20  ;;  %v2040_v13 = vld [vmem:[%s2200_s3 + $0x78] sm:$0xff]  ;;  %v660_v19 = vperm.slane %v1575_v16, 1  ;;  %v659_v23 = vperm.slane %v1575_v16, 0 }
 0x143   :  { %1115 = vmatpush.bf16.msra.mxu0 %v1752_v22  ;;  %1131 = vmatpush.bf16.msra.mxu1 %v1800_v28 }
 0x144   :  { %1103 = vmatpush.bf16.msrb.mxu3 %v1796_v25  ;;  %1088 = vmatpush.bf16.msrb.mxu2 %v1740_v32 }
 0x147   :  { %1116 = vmatpush.bf16.msra.mxu0 %v1744_v34 }
 0x148   :  { %1104 = vmatpush.bf16.msrb.mxu3 %v1788_v38 }
 0x1a6   :  { %v612_v39 = vpop.f32.mrf.mxu1 }
 0x1ab   :  { %v598_v40 = vpop.f32.mrf.mxu0 }
 0x1ac   :  { %v599_v42 = vadd.f32 %v598_v40, %v398_v41  ;;  %v584_v43 = vpop.f32.mrf.mxu3 }
 0x1ae   :  { %v613_v47 = vadd.f32 %v612_v39, %v599_v42  ;;  %v614_v49 = vpop.f32.mrf.mxu1  ;;  %v1789_v39 = vld [vmem:[#allocation2 + $0x3a8] sm:$0xf0]  ;;  %v2000_v42 = vld [vmem:[#allocation2 + $0x334] sm:$0xf0] }
 0x1af   :  { %v1792_v40 = vor.u32 %v2013_v37, %v1789_v39 }
 0x1b0   :  { %v618_v52 = vmax.f32 %v613_v47, 0.0  ;;  %v1779_v47 = vld [vmem:[#allocation2 + $0x390] sm:$0xf] }
 0x1b1   :  { %v570_v44 = vpop.f32.mrf.mxu2  ;;  %1132 = vmatpush.bf16.msra.mxu1 %v1792_v40 }
 0x1b2   :  { %v571_v50 = vadd.f32 %v570_v44, %v397_v45 }
 0x1b3   :  { %v600_v46 = vpop.f32.mrf.mxu0 }
 0x1b4   :  { %v601_v48 = vadd.f32 %v600_v46, %v398_v41  ;;  %v585_v55 = vadd.f32 %v584_v43, %v571_v50  ;;  %v586_v58 = vpop.f32.mrf.mxu3  ;;  %v1731_v41 = vld [vmem:[#allocation2 + $0x330] sm:$0xf]  ;;  %v1999_v43 = vld [vmem:[#allocation2 + $0x334] sm:$0xf] }
 0x1b5   :  { %v1732_v44 = vor.u32 %v2000_v42, %v1731_v41  ;;  %v2038_v41 = vld [vmem:[%s2200_s3 + $0x68] sm:$0xff]  ;;  %v2031_v42 = vld [vmem:[%s2200_s3 + $0x30] sm:$0xff] }
 0x1b6   :  { %v615_v51 = vadd.f32 %v614_v49, %v601_v48  ;;  %v617_v60 = vmax.f32 %v585_v55, 0.0  ;;  %v2012_v48 = vld [vmem:[#allocation2 + $0x394] sm:$0xf0]  ;;  %v2011_v49 = vld [vmem:[#allocation2 + $0x394] sm:$0xf] }
 0x1b7   :  { %1089 = vmatpush.bf16.msrb.mxu2 %v1732_v44  ;;  %v1780_v50 = vor.u32 %v2012_v48, %v1779_v47  ;;  %v1997_v55 = vld [vmem:[#allocation2 + $0x324] sm:$0xf]  ;;  %v2030_v44 = vld [vmem:[%s2200_s3 + $0x28] sm:$0xff]  ;;  %v2035_v47 = vld [vmem:[%s2200_s3 + $0x50] sm:$0xff] }
 0x1b8   :  { %v620_v53 = vmax.f32 %v615_v51, 0.0  ;;  %v1781_v51 = vld [vmem:[#allocation2 + $0x398] sm:$0xf0] }
 0x1b9   :  { %v572_v54 = vpop.f32.mrf.mxu2  ;;  %1105 = vmatpush.bf16.msrb.mxu3 %v1780_v50  ;;  %v2028_v48 = vld [vmem:[%s2200_s3 + $0x18] sm:$0xff]  ;;  %v2027_v50 = vld [vmem:[%s2200_s3 + $0x10] sm:$0xff] }
 0x1ba   :  { %v622_v56 = vpack.c.bf16 %v620_v53, %v618_v52  ;;  %v573_v57 = vadd.f32 %v572_v54, %v397_v45  ;;  %v1733_v45 = vld [vmem:[#allocation2 + $0x338] sm:$0xf0]  ;;  %v1784_v52 = vor.u32 %v2011_v49, %v1781_v51  ;;  %v1723_v53 = vld [vmem:[#allocation2 + $0x320] sm:$0xf]  ;;  %v1998_v54 = vld [vmem:[#allocation2 + $0x324] sm:$0xf0] }
 0x1bb   :  { %v1736_v46 = vor.u32 %v1999_v43, %v1733_v45  ;;  %v2037_v43 = vld [vmem:[%s2200_s3 + $0x60] sm:$0xff]  ;;  %v2036_v45 = vld [vmem:[%s2200_s3 + $0x58] sm:$0xff]  ;;  %v2034_v49 = vld [vmem:[%s2200_s3 + $0x48] sm:$0xff] }
 0x1bc   :  { %v587_v59 = vadd.f32 %v586_v58, %v573_v57  ;;  %845 = vmatmul.bf16.vlgmr.msra.gmra.mxu3 %v622_v56  ;;  %873 = vmatmul.bf16.vlgmr.msrb.gmra.mxu1 %v622_v56  ;;  %v1724_v56 = vor.u32 %v1998_v54, %v1723_v53  ;;  %v1725_v57 = vld [vmem:[#allocation2 + $0x328] sm:$0xf0]  ;;  %v2033_v51 = vld [vmem:[%s2200_s3 + $0x40] sm:$0xff] }
 0x1bd   :  { %1117 = vmatpush.bf16.msra.mxu0 %v1736_v46  ;;  %1133 = vmatpush.bf16.msra.mxu1 %v1784_v52  ;;  %v1728_v58 = vor.u32 %v1997_v55, %v1725_v57  ;;  %v2029_v46 = vld [vmem:[%s2200_s3 + $0x20] sm:$0xff]  ;;  %v2026_v52 = vld [vmem:[%s2200_s3 + $0x8] sm:$0xff] }
 0x1be   :  { %v619_v61 = vmax.f32 %v587_v59, 0.0  ;;  %v1771_v59 = vld [vmem:[#allocation2 + $0x380] sm:$0xf]  ;;  %1090 = vmatpush.bf16.msrb.mxu2 %v1724_v56  ;;  %v1704_v54 = vld [vmem:[%s2201_s4 + $0x4] ss:$8 sm:$0x3] }
 0x1bf   :  { %v2025_v53 = vld [vmem:[%s2200_s3] sm:$0xff]  ;;  %v922_v57 = vperm.slane %v1704_v54, 1 }
 0x1c0   :  { %v621_v62 = vpack.c.bf16 %v619_v61, %v617_v60  ;;  %v2010_v60 = vld [vmem:[#allocation2 + $0x384] sm:$0xf0]  ;;  %v2009_v61 = vld [vmem:[#allocation2 + $0x384] sm:$0xf] }
 0x1c1   :  { %1118 = vmatpush.bf16.msra.mxu0 %v1728_v58  ;;  %v1776_v0 = vor.u32 %v2009_v61, %v1773_v63  ;;  %v921_v61 = vperm.slane %v1704_v54, 0 }
 0x1c2   :  { %831 = vmatmul.bf16.vlgmr.msra.gmra.mxu2 %v621_v62  ;;  %859 = vmatmul.bf16.vlgmr.msrb.gmra.mxu0 %v621_v62  ;;  %v1772_v62 = vor.u32 %v2010_v60, %v1771_v59 }
 0x1c3   :  { %1134 = vmatpush.bf16.msra.mxu1 %v1776_v0  ;;  %1091 = vmatpush.bf16.msrb.mxu2 %v1716_v4 }
 0x1c4   :  { %1106 = vmatpush.bf16.msrb.mxu3 %v1772_v62 }
 0x1c5   :  { %1119 = vmatpush.bf16.msra.mxu0 %v1720_v6 }
 0x1c7   :  { %1092 = vmatpush.bf16.msrb.mxu2 %v1708_v10 }
 0x1c8   :  { %1293 = vmatpush.bf16.msra.mxu3 %v2040_v13 }
 0x1c9   :  { %1120 = vmatpush.bf16.msra.mxu0 %v1712_v12 }
 0x1cb   :  { %1279 = vmatpush.bf16.msra.mxu2 %v2032_v14 }
 0x1cc   :  { %1294 = vmatpush.bf16.msra.mxu3 %v2039_v15  ;;  %v2044_v15 = vld [vmem:[%s2202_s5] ss:$0 sm:$0xff] }
 0x1cf   :  { %1280 = vmatpush.bf16.msra.mxu2 %v2031_v42 }
 0x1d0   :  { %1295 = vmatpush.bf16.msra.mxu3 %v2038_v41 }
 0x1d3   :  { %1281 = vmatpush.bf16.msra.mxu2 %v2030_v44 }
 0x1d4   :  { %1296 = vmatpush.bf16.msra.mxu3 %v2037_v43 }
 0x1d7   :  { %1282 = vmatpush.bf16.msra.mxu2 %v2029_v46 }
 0x1d8   :  { %1297 = vmatpush.bf16.msra.mxu3 %v2036_v45 }
 0x1db   :  { %1283 = vmatpush.bf16.msra.mxu2 %v2028_v48 }
 0x1dc   :  { %1298 = vmatpush.bf16.msra.mxu3 %v2035_v47 }
 0x1df   :  { %1284 = vmatpush.bf16.msra.mxu2 %v2027_v50 }
 0x1e0   :  { %1299 = vmatpush.bf16.msra.mxu3 %v2034_v49 }
 0x1e3   :  { %1285 = vmatpush.bf16.msra.mxu2 %v2026_v52 }
 0x1e4   :  { %1300 = vmatpush.bf16.msra.mxu3 %v2033_v51 }
 0x1e7   :  { %1286 = vmatpush.bf16.msra.mxu2 %v2025_v53 }
 0x239   :  { %v874_v17 = vpop.f32.mrf.mxu1 }
 0x23f   :  { %v860_v18 = vpop.f32.mrf.mxu0  ;;  %v846_v21 = vpop.f32.mrf.mxu3 }
 0x240   :  { %v861_v20 = vadd.f32 %v860_v18, %v660_v19 }
 0x241   :  { %v876_v27 = vpop.f32.mrf.mxu1 }
 0x242   :  { %v875_v25 = vadd.f32 %v874_v17, %v861_v20 }
 0x244   :  { %v880_v30 = vmax.f32 %v875_v25, 0.0 }
 0x245   :  { %v832_v22 = vpop.f32.mrf.mxu2 }
 0x246   :  { %v833_v28 = vadd.f32 %v832_v22, %v659_v23 }
 0x247   :  { %v862_v24 = vpop.f32.mrf.mxu0  ;;  %v848_v36 = vpop.f32.mrf.mxu3 }
 0x248   :  { %v863_v26 = vadd.f32 %v862_v24, %v660_v19  ;;  %v847_v33 = vadd.f32 %v846_v21, %v833_v28 }
 0x24a   :  { %v877_v29 = vadd.f32 %v876_v27, %v863_v26  ;;  %v879_v38 = vmax.f32 %v847_v33, 0.0 }
 0x24c   :  { %v882_v31 = vmax.f32 %v877_v29, 0.0 }
 0x24d   :  { %v834_v32 = vpop.f32.mrf.mxu2 }
 0x24e   :  { %v884_v34 = vpack.c.bf16 %v882_v31, %v880_v30  ;;  %v835_v35 = vadd.f32 %v834_v32, %v659_v23 }
 0x250   :  { %v849_v37 = vadd.f32 %v848_v36, %v835_v35  ;;  %1107 = vmatmul.bf16.vlgmr.msrb.gmra.mxu3 %v884_v34  ;;  %1135 = vmatmul.bf16.vlgmr.msra.gmra.mxu1 %v884_v34 }
 0x252   :  { %v881_v39 = vmax.f32 %v849_v37, 0.0 }
 0x254   :  { %v883_v40 = vpack.c.bf16 %v881_v39, %v879_v38 }
 0x256   :  { %1093 = vmatmul.bf16.vlgmr.msrb.gmra.mxu2 %v883_v40  ;;  %1121 = vmatmul.bf16.vlgmr.msra.gmra.mxu0 %v883_v40 }
 0x2cd   :  { %v1136_v55 = vpop.f32.mrf.mxu1 }
 0x2d3   :  { %v1122_v56 = vpop.f32.mrf.mxu0  ;;  %v1108_v59 = vpop.f32.mrf.mxu3 }
 0x2d4   :  { %v1123_v58 = vadd.f32 %v1122_v56, %v922_v57 }
 0x2d5   :  { %v1138_v1 = vpop.f32.mrf.mxu1 }
 0x2d6   :  { %v1137_v63 = vadd.f32 %v1136_v55, %v1123_v58 }
 0x2d8   :  { %v1142_v4 = vmax.f32 %v1137_v63, 0.0 }
 0x2d9   :  { %v1094_v60 = vpop.f32.mrf.mxu2 }
 0x2da   :  { %v1095_v2 = vadd.f32 %v1094_v60, %v921_v61 }
 0x2db   :  { %v1124_v62 = vpop.f32.mrf.mxu0  ;;  %v1110_v10 = vpop.f32.mrf.mxu3 }
 0x2dc   :  { %v1125_v0 = vadd.f32 %v1124_v62, %v922_v57  ;;  %v1109_v7 = vadd.f32 %v1108_v59, %v1095_v2 }
 0x2de   :  { %v1139_v3 = vadd.f32 %v1138_v1, %v1125_v0  ;;  %v1141_v12 = vmax.f32 %v1109_v7, 0.0 }
 0x2e0   :  { %v1144_v5 = vmax.f32 %v1139_v3, 0.0 }
 0x2e1   :  { %v1096_v6 = vpop.f32.mrf.mxu2 }
 0x2e2   :  { %v1146_v8 = vpack.c.bf16 %v1144_v5, %v1142_v4  ;;  %v1097_v9 = vadd.f32 %v1096_v6, %v921_v61 }
 0x2e4   :  { %v1111_v11 = vadd.f32 %v1110_v10, %v1097_v9  ;;  %1301 = vmatmul.bf16.vlgmr.msra.gmra.mxu3 %v1146_v8 }
 0x2e6   :  { %v1143_v13 = vmax.f32 %v1111_v11, 0.0 }
 0x2e8   :  { %v1145_v14 = vpack.c.bf16 %v1143_v13, %v1141_v12 }
 0x2ea   :  { %1287 = vmatmul.bf16.vlgmr.msra.gmra.mxu2 %v1145_v14 }
 0x367   :  { %v1302_v16 = vpop.f32.mrf.mxu3 }
 0x36d   :  { %v1288_v17 = vpop.f32.mrf.mxu2 }
 0x36e   :  { %v1289_v18 = vadd.f32 %v2044_v15, %v1288_v17 }
 0x36f   :  { %v1304_v22 = vpop.f32.mrf.mxu3 }
 0x370   :  { %v1303_v19 = vadd.f32 %v1302_v16, %v1289_v18 }
 0x372   :  { %1308 = vst.msk [vmem:[%s2203_s6] sm:$0xff] %vm1307_vm2, %v1303_v19 }
 0x375   :  { %v1290_v20 = vpop.f32.mrf.mxu2 }
 0x376   :  { %v1291_v21 = vadd.f32 %v2044_v15, %v1290_v20 }
 0x378   :  { %v1305_v23 = vadd.f32 %v1304_v22, %v1291_v21 }
 0x37a   :  { %1309 = vst.msk [vmem:[%s2203_s6 + $0x8] sm:$0xff] %vm1307_vm2, %v1305_v23 }
 0x37b   :  { %1314 = vsyncpa [#allocation3], 1 }

</bundles_post_ra>
